<compile_context>
chip_gen: v5e
topology: v5e:2x2
jax: 0.10.0
libtpu: 0.0.40
codegen_flags: <defaults>
</compile_context>

<pallas_src>
import functools

import jax
import jax.numpy as jnp
from jax.experimental import pallas as pl
from jax.experimental.pallas import tpu as pltpu


def _round_up(v, m):
    return (v + m - 1) // m * m


def _choose_bb(B, N, J, *, row_target=512, wblock_bytes_cap=2 * 1024 * 1024):
    """Largest divisor of B with BB*N <= row_target rows and a small double-buffered
    bf16 W block; prefer >= 2 grid steps when B > 1 (DMA/compute overlap, v7x cores)."""
    best = 1
    for cand in range(1, B + 1):
        if B % cand:
            continue
        rows = cand * N
        wblk = 2 * cand * J * N * N * 2          # double-buffered bf16 W block
        if rows <= row_target and wblk <= wblock_bytes_cap:
            best = cand
    if best == B and B > 1:
        for cand in range(best - 1, 0, -1):
            if B % cand == 0:
                best = cand
                break
    return best


def _choose_row_tile(M, rows, target=2048):
    """Row tile for the BN-apply pass: largest multiple of `rows` dividing M, <= target."""
    G = M // rows
    k = 1
    for cand in range(1, G + 1):
        if G % cand == 0 and cand * rows <= target:
            k = cand
    return k * rows


def _gmul_fc(w_ref, x_ref, fcw_ref, fcb_ref, y_scr, *, J, N, BB):
    """Shared gmul + Linear core.  Returns pre-BN h: [BB*N, Fp] float32.

    w_ref : [BB, J, N, N] bf16   (j-leading: each W[b, j] is a lane-dense slab)
    x_ref : [BB, N, F_in] bf16
    fcw_ref: [J*F_in, Fp] bf16   (fc_w.T, zero-padded to Fp lanes, resident)
    fcb_ref: [1, Fp] f32
    y_scr : [BB*N, J*F_in] bf16  VMEM scratch (no in-kernel concatenates)
    """
    F_in = x_ref.shape[-1]
    for b in range(BB):                              # BB, J small & static (unrolled)
        xb = x_ref[b]                                # [N, F_in]
        for j in range(J):
            part = jnp.dot(w_ref[b, j], xb,
                           preferred_element_type=jnp.float32)       # [N, F_in]
            y_scr[b * N:(b + 1) * N, j * F_in:(j + 1) * F_in] = part.astype(y_scr.dtype)
    # Single wide MXU matmul for the Linear layer (M = BB*N, K = J*F_in, N = Fp).
    h = jnp.dot(y_scr[...], fcw_ref[...], preferred_element_type=jnp.float32)
    return h + fcb_ref[...]                          # [BB*N, Fp] f32


def _gconv_fused_bn_kernel(w_ref, x_ref, fcw_ref, fcb_ref, gamma_ref, beta_ref,
                           out_ref, y_scr, sum_scr, *, J, N, BB, G, F_out, eps):
    """Fully fused gmul + fc + BatchNorm.  out_ref ([M, F_out] f32) is VMEM-resident
    across the whole grid: it stages pre-BN activations and is normalized in place."""
    g = pl.program_id(0)
    rows = BB * N

    @pl.when(g == 0)
    def _():
        sum_scr[...] = jnp.zeros_like(sum_scr)

    h = _gmul_fc(w_ref, x_ref, fcw_ref, fcb_ref, y_scr, J=J, N=N, BB=BB)
    h_o = h[:, :F_out]                               # drop zero-padded fc columns in-kernel

    row0 = pl.multiple_of(g * rows, rows)
    out_ref[pl.ds(row0, rows), :] = h_o
    sum_scr[...] += jnp.sum(h_o, axis=0, keepdims=True)

    @pl.when(g == G - 1)
    def _():
        m_total = float(G * rows)
        mean = sum_scr[...] * (1.0 / m_total)        # [1, F_out]

        # Numerically stable two-pass variance over the VMEM-resident activations.
        def var_step(i, acc):
            r0 = pl.multiple_of(i * rows, rows)
            d = out_ref[pl.ds(r0, rows), :] - mean
            return acc + jnp.sum(d * d, axis=0, keepdims=True)

        var = jax.lax.fori_loop(0, G, var_step, jnp.zeros_like(mean)) * (1.0 / m_total)
        scale = gamma_ref[...] * jax.lax.rsqrt(var + eps)
        shift = beta_ref[...] - mean * scale

        def apply_step(i, carry):
            r0 = pl.multiple_of(i * rows, rows)
            out_ref[pl.ds(r0, rows), :] = out_ref[pl.ds(r0, rows), :] * scale + shift
            return carry

        jax.lax.fori_loop(0, G, apply_step, 0)


def _gconv_plain_kernel(w_ref, x_ref, fcw_ref, fcb_ref, out_ref, y_scr,
                        *, J, N, BB, F_out):
    """gmul + fc only (bn_bool=False)."""
    h = _gmul_fc(w_ref, x_ref, fcw_ref, fcb_ref, y_scr, J=J, N=N, BB=BB)
    out_ref[...] = h[:, :F_out]


def _gconv_stage_kernel(w_ref, x_ref, fcw_ref, fcb_ref,
                        h_ref, psum_ref, pssq_ref, y_scr, *, J, N, BB, F_out):
    """Fallback pass 1: gmul + fc, bf16 pre-BN staging + per-group stable stats."""
    h = _gmul_fc(w_ref, x_ref, fcw_ref, fcb_ref, y_scr, J=J, N=N, BB=BB)
    h_o = h[:, :F_out]                               # [BB*N, F_out] f32
    h_ref[...] = h_o.astype(h_ref.dtype)             # bf16 staging (halves HBM traffic)
    s = jnp.sum(h_o, axis=0, keepdims=True)          # [1, F_out]
    m_g = s * (1.0 / (BB * N))
    d = h_o - m_g                                    # group-centered -> stable combine
    psum_ref[0] = s
    pssq_ref[0] = jnp.sum(d * d, axis=0, keepdims=True)


def _bn_apply_kernel(h_ref, scale_ref, shift_ref, o_ref):
    """Fallback pass 2: out = h * scale + shift (per column)."""
    o_ref[...] = h_ref[...].astype(jnp.float32) * scale_ref[...] + shift_ref[...]


def _params(semantics):
    return pltpu.CompilerParams(dimension_semantics=(semantics,),
                                vmem_limit_bytes=32 * 1024 * 1024)


@functools.partial(jax.jit, static_argnames=("bn_bool", "eps", "force_two_pass"))
def gconv_forward(W, x, fc_w, fc_b, bn_gamma, bn_beta, *, bn_bool=True, eps=1e-5,
                  force_two_pass=False):
    """Pallas implementation of Gconv.forward. Returns (W, x_out)."""
    B, N, _, J = W.shape
    F_in = x.shape[-1]
    F_out = fc_w.shape[0]
    Fp = _round_up(F_out, 128)            # lane-dense fc matmul width (dropped in-kernel)
    M = B * N

    BB = _choose_bb(B, N, J)
    G = B // BB
    rows = BB * N

    # Layout glue (fused by XLA into ONE pass over W under jit): j-leading + bf16 cast.
    W_j = jnp.transpose(W, (0, 3, 1, 2)).astype(jnp.bfloat16)       # [B, J, N, N]
    x_b = x.astype(jnp.bfloat16)
    fcw_pad = jnp.zeros((J * F_in, Fp), jnp.bfloat16).at[:, :F_out].set(
        jnp.transpose(fc_w).astype(jnp.bfloat16))
    fcb_pad = jnp.zeros((1, Fp), jnp.float32).at[:, :F_out].set(fc_b.astype(jnp.float32))

    common_in_specs = [
        pl.BlockSpec((BB, J, N, N), lambda g: (g, 0, 0, 0)),
        pl.BlockSpec((BB, N, F_in), lambda g: (g, 0, 0)),
        pl.BlockSpec((J * F_in, Fp), lambda g: (0, 0)),     # resident, fetched once
        pl.BlockSpec((1, Fp), lambda g: (0, 0)),            # resident, fetched once
    ]

    if not bn_bool:
        out = pl.pallas_call(
            functools.partial(_gconv_plain_kernel, J=J, N=N, BB=BB, F_out=F_out),
            grid=(G,),
            in_specs=common_in_specs,
            out_specs=pl.BlockSpec((rows, F_out), lambda g: (g, 0)),
            out_shape=jax.ShapeDtypeStruct((M, F_out), jnp.float32),
            scratch_shapes=[pltpu.VMEM((rows, J * F_in), jnp.bfloat16)],
            compiler_params=_params("parallel"),
        )(W_j, x_b, fcw_pad, fcb_pad)
        return W, out.reshape(B, N, F_out)

    gamma2 = bn_gamma.reshape(1, F_out).astype(jnp.float32)
    beta2 = bn_beta.reshape(1, F_out).astype(jnp.float32)

    # VMEM footprint of the fused single-pass variant (resident output + double-buffered
    # W/x blocks + resident fc weight + y scratch + fc result).  Gate conservatively so
    # it also fits v7x's smaller VMEM with the 32 MiB scoped limit set above.
    fused_vmem = (M * F_out * 4
                  + 2 * BB * J * N * N * 2
                  + 2 * BB * N * F_in * 2
                  + J * F_in * Fp * 2
                  + rows * J * F_in * 2
                  + rows * Fp * 4)
    use_fused = (not force_two_pass) and fused_vmem <= 20 * 1024 * 1024

    if use_fused:
        out = pl.pallas_call(
            functools.partial(_gconv_fused_bn_kernel, J=J, N=N, BB=BB, G=G,
                              F_out=F_out, eps=eps),
            grid=(G,),
            in_specs=common_in_specs + [
                pl.BlockSpec((1, F_out), lambda g: (0, 0)),
                pl.BlockSpec((1, F_out), lambda g: (0, 0)),
            ],
            out_specs=pl.BlockSpec((M, F_out), lambda g: (0, 0)),   # resident accumulator
            out_shape=jax.ShapeDtypeStruct((M, F_out), jnp.float32),
            scratch_shapes=[pltpu.VMEM((rows, J * F_in), jnp.bfloat16),
                            pltpu.VMEM((1, F_out), jnp.float32)],
            compiler_params=_params("arbitrary"),
        )(W_j, x_b, fcw_pad, fcb_pad, gamma2, beta2)
        return W, out.reshape(B, N, F_out)

    # ---- Large-shape fallback: bf16 staging + Chan-combined stats + tiled BN apply ----
    pre_bn, psum, pssq = pl.pallas_call(
        functools.partial(_gconv_stage_kernel, J=J, N=N, BB=BB, F_out=F_out),
        grid=(G,),
        in_specs=common_in_specs,
        out_specs=[
            pl.BlockSpec((rows, F_out), lambda g: (g, 0)),
            pl.BlockSpec((1, 1, F_out), lambda g: (g, 0, 0)),
            pl.BlockSpec((1, 1, F_out), lambda g: (g, 0, 0)),
        ],
        out_shape=[
            jax.ShapeDtypeStruct((M, F_out), jnp.bfloat16),
            jax.ShapeDtypeStruct((G, 1, F_out), jnp.float32),
            jax.ShapeDtypeStruct((G, 1, F_out), jnp.float32),
        ],
        scratch_shapes=[pltpu.VMEM((rows, J * F_in), jnp.bfloat16)],
        compiler_params=_params("parallel"),
    )(W_j, x_b, fcw_pad, fcb_pad)

    # Combine per-group statistics (tiny, G x F_out) with the parallel-variance formula.
    n_g = float(rows)
    group_sum = psum[:, 0, :]                                        # [G, F_out]
    group_ssq = pssq[:, 0, :]
    mean = jnp.sum(group_sum, axis=0, keepdims=True) / M             # [1, F_out]
    group_mean = group_sum / n_g
    var = (jnp.sum(group_ssq, axis=0, keepdims=True)
           + n_g * jnp.sum((group_mean - mean) ** 2, axis=0, keepdims=True)) / M
    scale = gamma2 * jax.lax.rsqrt(var + eps)
    shift = beta2 - mean * scale

    TR = _choose_row_tile(M, rows)
    out = pl.pallas_call(
        _bn_apply_kernel,
        grid=(M // TR,),
        in_specs=[
            pl.BlockSpec((TR, F_out), lambda i: (i, 0)),
            pl.BlockSpec((1, F_out), lambda i: (0, 0)),
            pl.BlockSpec((1, F_out), lambda i: (0, 0)),
        ],
        out_specs=pl.BlockSpec((TR, F_out), lambda i: (i, 0)),
        out_shape=jax.ShapeDtypeStruct((M, F_out), jnp.float32),
        compiler_params=_params("parallel"),
    )(pre_bn, scale, shift)
    return W, out.reshape(B, N, F_out)


def _reference(W, x, fc_w, fc_b, g, b, bn=True, eps=1e-5):
    """Pure-JAX (f32) reference mirroring the PyTorch forward."""
    B, N, _, J = W.shape
    F_in = x.shape[-1]
    F_out = fc_w.shape[0]
    y = jnp.einsum("bnmj,bmf->bnjf", W, x).reshape(B * N, J * F_in)
    h = y @ fc_w.T + fc_b
    if bn:
        mean = h.mean(axis=0)
        var = ((h - mean) ** 2).mean(axis=0)
        h = (h - mean) / jnp.sqrt(var + eps) * g + b
    return h.reshape(B, N, F_out)


if __name__ == "__main__":
    # Small shapes consistent with the module: B graphs, N nodes, F_in features,
    # J adjacency operators, F_out output features.
    B, N, F_in, J, F_out = 2, 16, 8, 2, 32

    key = jax.random.PRNGKey(0)
    kW, kx, kfw, kfb = jax.random.split(key, 4)

    W = jax.random.normal(kW, (B, N, N, J), dtype=jnp.float32)
    x = jax.random.normal(kx, (B, N, F_in), dtype=jnp.float32)

    num_inputs = J * F_in
    bound = 1.0 / (num_inputs ** 0.5)
    fc_w = jax.random.uniform(kfw, (F_out, num_inputs), jnp.float32, -bound, bound)
    fc_b = jax.random.uniform(kfb, (F_out,), jnp.float32, -bound, bound)
    bn_gamma = jnp.ones((F_out,), jnp.float32)
    bn_beta = jnp.zeros((F_out,), jnp.float32)

    ref_bn = _reference(W, x, fc_w, fc_b, bn_gamma, bn_beta, bn=True)
    ref_nobn = _reference(W, x, fc_w, fc_b, bn_gamma, bn_beta, bn=False)

    # bf16 MXU operands (f32 accumulation) + bf16 staging on the fallback path.
    TOL = dict(atol=6e-2, rtol=6e-2)

    # 1) Fully fused single-pass kernel (default path at these shapes).
    _, out_fused = gconv_forward(W, x, fc_w, fc_b, bn_gamma, bn_beta, bn_bool=True)
    out_fused = jax.block_until_ready(out_fused)
    assert out_fused.shape == (B, N, F_out)
    assert jnp.allclose(out_fused, ref_bn, **TOL), "fused path mismatch vs reference"

    # 2) Large-shape two-pass fallback, forced at the same small shapes for coverage.
    _, out_two = gconv_forward(W, x, fc_w, fc_b, bn_gamma, bn_beta, bn_bool=True,
                               force_two_pass=True)
    out_two = jax.block_until_ready(out_two)
    assert jnp.allclose(out_two, ref_bn, **TOL), "two-pass path mismatch vs reference"

    # 3) bn_bool=False path.
    _, out_nobn = gconv_forward(W, x, fc_w, fc_b, bn_gamma, bn_beta, bn_bool=False)
    out_nobn = jax.block_until_ready(out_nobn)
    assert jnp.allclose(out_nobn, ref_nobn, **TOL), "no-BN path mismatch vs reference"

    print("KERNEL_OK")
</pallas_src>

<mosaic_0001>
module attributes {stable_mosaic.version = 11 : i64} {
  func.func @_gconv_fused_bn_kernel(%arg0: i32, %arg1: memref<1x2x16x16xbf16, #tpu.memory_space<vmem>>, %arg2: memref<1x16x8xbf16, #tpu.memory_space<vmem>>, %arg3: memref<16x128xbf16, #tpu.memory_space<vmem>>, %arg4: memref<1x128xf32, #tpu.memory_space<vmem>>, %arg5: memref<1x32xf32, #tpu.memory_space<vmem>>, %arg6: memref<1x32xf32, #tpu.memory_space<vmem>>, %arg7: memref<32x32xf32, #tpu.memory_space<vmem>>, %arg8: memref<16x16xbf16, #tpu.memory_space<vmem>>, %arg9: memref<1x32xf32, #tpu.memory_space<vmem>>) attributes {dimension_semantics = [#tpu.dimension_semantics<arbitrary>], iteration_bounds = array<i64: 2>, scalar_prefetch = 0 : i64, scratch_operands = 2 : i64, tpu.core_type = #tpu.core_type<tc>, window_params = [{transform_indices = @transform_0, window_bounds = array<i64: 1, 2, 16, 16>}, {transform_indices = @transform_1, window_bounds = array<i64: 1, 16, 8>}, {pipeline_mode = #tpu.pipeline_mode<synchronous>, transform_indices = @transform_2, window_bounds = array<i64: 16, 128>}, {pipeline_mode = #tpu.pipeline_mode<synchronous>, transform_indices = @transform_3, window_bounds = array<i64: 1, 128>}, {pipeline_mode = #tpu.pipeline_mode<synchronous>, transform_indices = @transform_4, window_bounds = array<i64: 1, 32>}, {pipeline_mode = #tpu.pipeline_mode<synchronous>, transform_indices = @transform_5, window_bounds = array<i64: 1, 32>}, {pipeline_mode = #tpu.pipeline_mode<synchronous>, transform_indices = @transform_6, window_bounds = array<i64: 32, 32>}]} {
    %c0_i32 = arith.constant 0 : i32
    %0 = arith.cmpi eq, %arg0, %c0_i32 : i32
    %1 = arith.extui %0 : i1 to i32
    %c0_i32_0 = arith.constant 0 : i32
    %2 = arith.cmpi ne, %1, %c0_i32_0 : i32
    scf.if %2 {
      %cst_28 = arith.constant 0.000000e+00 : f32
      %34 = vector.broadcast %cst_28 : f32 to vector<1x32xf32>
      %c0_29 = arith.constant 0 : index
      %c0_30 = arith.constant 0 : index
      %35 = vector.load %arg9[%c0_29, %c0_30] : memref<1x32xf32, #tpu.memory_space<vmem>>, vector<1x32xf32>
      tpu.vector_store %arg9[%c0_29, %c0_30], %34 {strides = array<i32>} : memref<1x32xf32, #tpu.memory_space<vmem>>, vector<1x32xf32>,
    } else {
    }
    %c0 = arith.constant 0 : index
    %c0_1 = arith.constant 0 : index
    %c0_2 = arith.constant 0 : index
    %3 = vector.load %arg2[%c0, %c0_1, %c0_2] : memref<1x16x8xbf16, #tpu.memory_space<vmem>>, vector<1x16x8xbf16>
    %4 = vector.shape_cast %3 : vector<1x16x8xbf16> to vector<16x8xbf16>
    %c0_3 = arith.constant 0 : index
    %c0_4 = arith.constant 0 : index
    %c0_5 = arith.constant 0 : index
    %c0_6 = arith.constant 0 : index
    %5 = vector.load %arg1[%c0_3, %c0_4, %c0_5, %c0_6] : memref<1x2x16x16xbf16, #tpu.memory_space<vmem>>, vector<1x1x16x16xbf16>
    %6 = vector.shape_cast %5 : vector<1x1x16x16xbf16> to vector<16x16xbf16>
    %cst = arith.constant dense<0.000000e+00> : vector<16x8xf32>
    %7 = tpu.matmul %6, %4, %cst {dimension_numbers = #tpu.dot_dimension_numbers<[1], [0], [0], [1], [0, 0, 1, 1], [], []>} : vector<16x16xbf16>, vector<16x8xbf16>, vector<16x8xf32> -> vector<16x8xf32>
    %8 = arith.truncf %7 : vector<16x8xf32> to vector<16x8xbf16>
    %c0_7 = arith.constant 0 : index
    %c0_8 = arith.constant 0 : index
    %9 = vector.load %arg8[%c0_7, %c0_8] : memref<16x16xbf16, #tpu.memory_space<vmem>>, vector<16x8xbf16>
    tpu.vector_store %arg8[%c0_7, %c0_8], %8 {strides = array<i32>} : memref<16x16xbf16, #tpu.memory_space<vmem>>, vector<16x8xbf16>,
    %c0_9 = arith.constant 0 : index
    %c1 = arith.constant 1 : index
    %c0_10 = arith.constant 0 : index
    %c0_11 = arith.constant 0 : index
    %10 = vector.load %arg1[%c0_9, %c1, %c0_10, %c0_11] : memref<1x2x16x16xbf16, #tpu.memory_space<vmem>>, vector<1x1x16x16xbf16>
    %11 = vector.shape_cast %10 : vector<1x1x16x16xbf16> to vector<16x16xbf16>
    %cst_12 = arith.constant dense<0.000000e+00> : vector<16x8xf32>
    %12 = tpu.matmul %11, %4, %cst_12 {dimension_numbers = #tpu.dot_dimension_numbers<[1], [0], [0], [1], [0, 0, 1, 1], [], []>} : vector<16x16xbf16>, vector<16x8xbf16>, vector<16x8xf32> -> vector<16x8xf32>
    %13 = arith.truncf %12 : vector<16x8xf32> to vector<16x8xbf16>
    %c0_13 = arith.constant 0 : index
    %c8 = arith.constant 8 : index
    %14 = vector.load %arg8[%c0_13, %c8] : memref<16x16xbf16, #tpu.memory_space<vmem>>, vector<16x8xbf16>
    tpu.vector_store %arg8[%c0_13, %c8], %13 {strides = array<i32>} : memref<16x16xbf16, #tpu.memory_space<vmem>>, vector<16x8xbf16>,
    %c0_14 = arith.constant 0 : index
    %c0_15 = arith.constant 0 : index
    %15 = vector.load %arg8[%c0_14, %c0_15] : memref<16x16xbf16, #tpu.memory_space<vmem>>, vector<16x16xbf16>
    %c0_16 = arith.constant 0 : index
    %c0_17 = arith.constant 0 : index
    %16 = vector.load %arg3[%c0_16, %c0_17] : memref<16x128xbf16, #tpu.memory_space<vmem>>, vector<16x128xbf16>
    %cst_18 = arith.constant dense<0.000000e+00> : vector<16x128xf32>
    %17 = tpu.matmul %15, %16, %cst_18 {dimension_numbers = #tpu.dot_dimension_numbers<[1], [0], [0], [1], [0, 0, 1, 1], [], []>} : vector<16x16xbf16>, vector<16x128xbf16>, vector<16x128xf32> -> vector<16x128xf32>
    %c0_19 = arith.constant 0 : index
    %c0_20 = arith.constant 0 : index
    %18 = vector.load %arg4[%c0_19, %c0_20] : memref<1x128xf32, #tpu.memory_space<vmem>>, vector<1x128xf32>
    %19 = vector.broadcast %18 : vector<1x128xf32> to vector<16x128xf32>
    %20 = arith.addf %17, %19 : vector<16x128xf32>
    %21 = vector.extract_strided_slice %20 {offsets = [0, 0], sizes = [16, 32], strides = [1, 1]} : vector<16x128xf32> to vector<16x32xf32>
    %c16_i32 = arith.constant 16 : i32
    %22 = arith.muli %arg0, %c16_i32 : i32
    %23 = tpu.assume_multiple %22, 16 : i32
    %24 = arith.index_cast %23 : i32 to index
    %c0_21 = arith.constant 0 : index
    %25 = vector.load %arg7[%24, %c0_21] : memref<32x32xf32, #tpu.memory_space<vmem>>, vector<16x32xf32>
    tpu.vector_store %arg7[%24, %c0_21], %21 {strides = array<i32>} : memref<32x32xf32, #tpu.memory_space<vmem>>, vector<16x32xf32>,
    %c0_22 = arith.constant 0 : index
    %c0_23 = arith.constant 0 : index
    %26 = vector.load %arg9[%c0_22, %c0_23] : memref<1x32xf32, #tpu.memory_space<vmem>>, vector<1x32xf32>
    %cst_24 = arith.constant dense<0.000000e+00> : vector<32xf32>
    %27 = vector.multi_reduction <add>, %21, %cst_24 [0] : vector<16x32xf32> to vector<32xf32>
    %28 = vector.shape_cast %27 : vector<32xf32> to vector<1x32xf32>
    %29 = arith.addf %26, %28 : vector<1x32xf32>
    %c0_25 = arith.constant 0 : index
    %c0_26 = arith.constant 0 : index
    %30 = vector.load %arg9[%c0_25, %c0_26] : memref<1x32xf32, #tpu.memory_space<vmem>>, vector<1x32xf32>
    tpu.vector_store %arg9[%c0_25, %c0_26], %29 {strides = array<i32>} : memref<1x32xf32, #tpu.memory_space<vmem>>, vector<1x32xf32>,
    %c1_i32 = arith.constant 1 : i32
    %31 = arith.cmpi eq, %arg0, %c1_i32 : i32
    %32 = arith.extui %31 : i1 to i32
    %c0_i32_27 = arith.constant 0 : i32
    %33 = arith.cmpi ne, %32, %c0_i32_27 : i32
    scf.if %33 {
      %c0_28 = arith.constant 0 : index
      %c0_29 = arith.constant 0 : index
      %34 = vector.load %arg9[%c0_28, %c0_29] : memref<1x32xf32, #tpu.memory_space<vmem>>, vector<1x32xf32>
      %cst_30 = arith.constant 3.125000e-02 : f32
      %35 = vector.broadcast %cst_30 : f32 to vector<1x32xf32>
      %36 = arith.mulf %34, %35 : vector<1x32xf32>
      %cst_31 = arith.constant 0.000000e+00 : f32
      %37 = vector.broadcast %cst_31 : f32 to vector<1x32xf32>
      %c0_i32_32 = arith.constant 0 : i32
      %c2_i32 = arith.constant 2 : i32
      %38 = arith.addi %c0_i32_32, %c2_i32 : i32
      %c1_i32_33 = arith.constant 1 : i32
      %39 = scf.for %arg10 = %c0_i32_32 to %38 step %c1_i32_33 iter_args(%arg11 = %37) -> (vector<1x32xf32>)  : i32 {
        %c16_i32_45 = arith.constant 16 : i32
        %51 = arith.muli %arg10, %c16_i32_45 : i32
        %52 = tpu.assume_multiple %51, 16 : i32
        %53 = arith.index_cast %52 : i32 to index
        %c0_46 = arith.constant 0 : index
        %54 = vector.load %arg7[%53, %c0_46] : memref<32x32xf32, #tpu.memory_space<vmem>>, vector<16x32xf32>
        %55 = vector.broadcast %36 : vector<1x32xf32> to vector<16x32xf32>
        %56 = arith.subf %54, %55 : vector<16x32xf32>
        %57 = arith.mulf %56, %56 : vector<16x32xf32>
        %cst_47 = arith.constant dense<0.000000e+00> : vector<32xf32>
        %58 = vector.multi_reduction <add>, %57, %cst_47 [0] : vector<16x32xf32> to vector<32xf32>
        %59 = vector.shape_cast %58 : vector<32xf32> to vector<1x32xf32>
        %60 = arith.addf %arg11, %59 : vector<1x32xf32>
        scf.yield %60 : vector<1x32xf32>
      }
      %c2_i32_34 = arith.constant 2 : i32
      %cst_35 = arith.constant 3.125000e-02 : f32
      %40 = vector.broadcast %cst_35 : f32 to vector<1x32xf32>
      %41 = arith.mulf %39, %40 : vector<1x32xf32>
      %c0_36 = arith.constant 0 : index
      %c0_37 = arith.constant 0 : index
      %42 = vector.load %arg5[%c0_36, %c0_37] : memref<1x32xf32, #tpu.memory_space<vmem>>, vector<1x32xf32>
      %cst_38 = arith.constant 9.99999974E-6 : f32
      %43 = vector.broadcast %cst_38 : f32 to vector<1x32xf32>
      %44 = arith.addf %41, %43 : vector<1x32xf32>
      %45 = math.rsqrt %44 : vector<1x32xf32>
      %46 = arith.mulf %42, %45 : vector<1x32xf32>
      %c0_39 = arith.constant 0 : index
      %c0_40 = arith.constant 0 : index
      %47 = vector.load %arg6[%c0_39, %c0_40] : memref<1x32xf32, #tpu.memory_space<vmem>>, vector<1x32xf32>
      %48 = arith.mulf %36, %46 : vector<1x32xf32>
      %49 = arith.subf %47, %48 : vector<1x32xf32>
      %c0_i32_41 = arith.constant 0 : i32
      %c2_i32_42 = arith.constant 2 : i32
      %50 = arith.addi %c0_i32_41, %c2_i32_42 : i32
      %c1_i32_43 = arith.constant 1 : i32
      scf.for %arg10 = %c0_i32_41 to %50 step %c1_i32_43  : i32 {
        %c16_i32_45 = arith.constant 16 : i32
        %51 = arith.muli %arg10, %c16_i32_45 : i32
        %52 = tpu.assume_multiple %51, 16 : i32
        %53 = arith.index_cast %52 : i32 to index
        %c0_46 = arith.constant 0 : index
        %54 = vector.load %arg7[%53, %c0_46] : memref<32x32xf32, #tpu.memory_space<vmem>>, vector<16x32xf32>
        %55 = vector.broadcast %46 : vector<1x32xf32> to vector<16x32xf32>
        %56 = arith.mulf %54, %55 : vector<16x32xf32>
        %57 = vector.broadcast %49 : vector<1x32xf32> to vector<16x32xf32>
        %58 = arith.addf %56, %57 : vector<16x32xf32>
        %59 = arith.index_cast %52 : i32 to index
        %c0_47 = arith.constant 0 : index
        %60 = vector.load %arg7[%59, %c0_47] : memref<32x32xf32, #tpu.memory_space<vmem>>, vector<16x32xf32>
        tpu.vector_store %arg7[%59, %c0_47], %58 {strides = array<i32>} : memref<32x32xf32, #tpu.memory_space<vmem>>, vector<16x32xf32>,
      }
      %c2_i32_44 = arith.constant 2 : i32
    } else {
    }
    return
  }
  func.func @transform_0(%arg0: i32) -> (i32, i32, i32, i32) {
    %c0_i32 = arith.constant 0 : i32
    %c0_i32_0 = arith.constant 0 : i32
    %c0_i32_1 = arith.constant 0 : i32
    %c0_i32_2 = arith.constant 0 : i32
    return %arg0, %c0_i32, %c0_i32_0, %c0_i32_1 : i32, i32, i32, i32
  }
  func.func @transform_1(%arg0: i32) -> (i32, i32, i32) {
    %c0_i32 = arith.constant 0 : i32
    %c0_i32_0 = arith.constant 0 : i32
    %c0_i32_1 = arith.constant 0 : i32
    return %arg0, %c0_i32, %c0_i32_0 : i32, i32, i32
  }
  func.func @transform_2(%arg0: i32) -> (i32, i32) {
    %c0_i32 = arith.constant 0 : i32
    %c0_i32_0 = arith.constant 0 : i32
    %c0_i32_1 = arith.constant 0 : i32
    return %c0_i32, %c0_i32_0 : i32, i32
  }
  func.func @transform_3(%arg0: i32) -> (i32, i32) {
    %c0_i32 = arith.constant 0 : i32
    %c0_i32_0 = arith.constant 0 : i32
    %c0_i32_1 = arith.constant 0 : i32
    return %c0_i32, %c0_i32_0 : i32, i32
  }
  func.func @transform_4(%arg0: i32) -> (i32, i32) {
    %c0_i32 = arith.constant 0 : i32
    %c0_i32_0 = arith.constant 0 : i32
    %c0_i32_1 = arith.constant 0 : i32
    return %c0_i32, %c0_i32_0 : i32, i32
  }
  func.func @transform_5(%arg0: i32) -> (i32, i32) {
    %c0_i32 = arith.constant 0 : i32
    %c0_i32_0 = arith.constant 0 : i32
    %c0_i32_1 = arith.constant 0 : i32
    return %c0_i32, %c0_i32_0 : i32, i32
  }
  func.func @transform_6(%arg0: i32) -> (i32, i32) {
    %c0_i32 = arith.constant 0 : i32
    %c0_i32_0 = arith.constant 0 : i32
    %c0_i32_1 = arith.constant 0 : i32
    return %c0_i32, %c0_i32_0 : i32, i32
  }
}

</mosaic_0001>

<bundles_post_ra>
// kernel: gconv_forward.1
= control target key start
LH: loop header
LB: loop body
LE: loop exit
PB: predicated region body
PF: predicated region fallthrough
CT: control target
= control target key end

     0   :  { %11 = vsyncpa [#allocation5], 0  ;;  %s746_s21 = smov 0   ;;  %s800_s0 = inlined_call_operand.vmem [shape: bf16[2,2,16,16], index: 0, kind: input, shape index: {}]   ;;  %s801_s1 = inlined_call_operand.vmem [shape: bf16[2,16,8], index: 1, kind: input, shape index: {}]   ;;  %s802_s2 = inlined_call_operand.vmem [shape: bf16[16,128], index: 2, kind: input, shape index: {}]   ;;  %s803_s3 = inlined_call_operand.vmem [shape: f32[1,128], index: 3, kind: input, shape index: {}]   ;;  %s804_s4 = inlined_call_operand.vmem [shape: f32[1,32], index: 4, kind: input, shape index: {}]   ;;  %s805_s5 = inlined_call_operand.vmem [shape: f32[1,32], index: 5, kind: input, shape index: {}]   ;;  %s806_s6 = inlined_call_operand.hbm [shape: f32[32,32], index: 6, kind: output, shape index: {}]  }
   0x1 LB: > { %s752_s22 = sadd.s32 4294967295, %s693_s21   ;;  %p552_p0 = scmp.ge.s32.totalorder %s693_s21, 1  ;;  %s693_s21 = sphi %s746_s21, %s17_s21  }
   0x2   : > { %p218_p1 = scmp.lt.s32.totalorder %s693_s21, 3 }
   0x4   : > { %p219_p2 = pnand %p552_p0, %p218_p1 }
   0x5   : > { %p248_p3 = scmp.lt.s32.totalorder (!%p219_p2), %s752_s22, 1  ;;  %p557_p4 = scmp.ne.s32.totalorder (!%p219_p2), %s752_s22, 0 }
   0x6   : > { %222 = sbr.rel (%p219_p2) target bundleno = 516 (0x204), region = 44 }
   0xb   : > { %s249_s23 = scalar_select %p248_p3, %s752_s22, 1 }
   0xc   : > { %262 = sbr.rel (%p557_p4) target bundleno = 19 (0x13), region = 48 }
   0xd   : > { %s591_s24 = sshll.u32 %s249_s23, 4  ;;  %s592_s25 = sshll.u32 %s249_s23, 3 }
   0xe   : > { %s252_s28 = scalar_lea.vmem %s800_s0, %s591_s24  ;;  %s257_s7 = scalar_lea.vmem %s801_s1, %s592_s25 }
  0x11   : > { %vm263_vm0 = vcmask 253952   ;;  %v707_v0 = vmov 0.0  }
  0x12   : > { %264 = vst.msk [vmem:[#allocation3] sm:$0x1] %vm263_vm0, %v707_v0 }
  0x13 PF: > { %v593_v1 = vld [vmem:[%s257_s7] sm:$0xff]  ;;  %v595_v2 = vld [vmem:[%s252_s28 + $0x8] sm:$0xff]  ;;  %vm280_vm1 = vcmask 130048   ;;  %vm300_vm2 = vcmask 60416   ;;  %s708_s8 = smov 8   ;;  %vm338_vm3 = vcmask 126016  }
  0x14   : > { %v594_v3 = vld [vmem:[%s252_s28] sm:$0xff]  ;;  %321 = vmatpush.bf16.msra.mxu1 %v593_v1  ;;  %291 = vmatpush.bf16.msra.mxu0 %v593_v1  ;;  %s583_s13 = sshll.u32 %s752_s22, 4  ;;  %vm379_vm4 = vcmask 261120   ;;  %vm393_vm5 = vcmask 253952   ;;  %p584_p5 = scmp.ne.s32.totalorder %s752_s22, 1 }
  0x15   : > { %v597_v12 = vld [vmem:[%s802_s2] sm:$0xff]  ;;  %s378_s14 = scalar_lea.vmem [#allocation4], %s583_s13  ;;  %s699_s15 = smov (!%p584_p5), 0  }
  0x16   : > { %370 = vmatpush.bf16.msra.mxu2 %v597_v12  ;;  %v640_v16 = vld [vmem:[%s803_s3] ss:$0 sm:$0xff] }
  0x17   : > { %573 = vmatmul.msk.bf16.vlgmr.msra.gmra.mxu1 %vm280_vm1, %v595_v2  ;;  %566 = vmatmul.msk.bf16.vlgmr.msra.gmra.mxu0 %vm280_vm1, %v594_v3 }
  0x19   : > { %v382_v29 = vld [vmem:[#allocation3] sm:$0x1] }
  0x94   : > { %v323_v4 = vpop.f32.mrf.mxu1  ;;  %v293_v5 = vpop.f32.mrf.mxu0 }
  0x95   : > { %v328_v6 = vpack.c.bf16 %v323_v4, %v323_v4  ;;  %v298_v7 = vpack.c.bf16 %v293_v5, %v293_v5 }
  0x97   : > { %332 = vrot.lane.b32.xlu0 %v328_v6, %s708_s8  ;;  %301 = vst.msk [vmem:[#allocation2] sm:$0xf] %vm300_vm2, %v298_v7 }
  0x9c   : > { %v325_v8 = vpop.f32.mrf.mxu1  ;;  %v295_v9 = vpop.f32.mrf.mxu0 }
  0x9d   : > { %v329_v10 = vpack.c.bf16 %v325_v8, %v325_v8  ;;  %v299_v11 = vpack.c.bf16 %v295_v9, %v295_v9 }
  0x9f   : > { %334 = vrot.lane.b32.xlu0 %v329_v10, %s708_s8  ;;  %302 = vst.msk [vmem:[#allocation2 + $0x4] sm:$0xf] %vm300_vm2, %v299_v11 }
 0x109   : > { %v333_v13 = vpop.permute.xlu0 %332 }
 0x10a   : > { %339 = vst.msk [vmem:[#allocation2] sm:$0xf] %vm338_vm3, %v333_v13 }
 0x111   : > { %v335_v14 = vpop.permute.xlu0 %334 }
 0x112   : > { %340 = vst.msk [vmem:[#allocation2 + $0x4] sm:$0xf] %vm338_vm3, %v335_v14 }
 0x119   : > { %v596_v15 = vld [vmem:[#allocation2] sm:$0xff] }
 0x11a   : > { %582 = vmatmul.msk.bf16.vlgmr.msra.gmra.mxu2 %vm280_vm1, %v596_v15 }
 0x19d   : > { %v372_v17 = vpop.f32.mrf.mxu2 }
 0x19e   : > { %v373_v18 = vadd.f32 %v640_v16, %v372_v17 }
 0x1a0   : > { %380 = vst.msk [vmem:[%s378_s14] sm:$0xff] %vm379_vm4, %v373_v18  ;;  %v383_v21 = vsel %vm379_vm4, %v373_v18, 0.0 }
 0x1a5   : > { %v374_v19 = vpop.f32.mrf.mxu2 }
 0x1a6   : > { %v375_v20 = vadd.f32 %v640_v16, %v374_v19 }
 0x1a8   : > { %381 = vst.msk [vmem:[%s378_s14 + $0x8] sm:$0xff] %vm379_vm4, %v375_v20  ;;  %v384_v22 = vsel %vm379_vm4, %v375_v20, 0.0 }
 0x1a9   : > { %v385_v23 = vadd.f32 %v384_v22, %v383_v21 }
 0x1ab   : > { %v386_v24 = vrot.slane %v385_v23, 4 }
 0x1ad   : > { %v387_v25 = vadd.f32 %v386_v24, %v385_v23 }
 0x1af   : > { %v388_v26 = vrot.slane %v387_v25, 2 }
 0x1b1   : > { %v389_v27 = vadd.f32 %v388_v26, %v387_v25 }
 0x1b3   : > { %v390_v28 = vrot.slane %v389_v27, 1 }
 0x1b5   : > { %v391_v30 = vadd.f32 %v390_v28, %v389_v27  ;;  %398 = sbr.rel (%p584_p5) target bundleno = 510 (0x1fe), region = 52 }
 0x1b7   : > { %v392_v31 = vadd.f32 %v391_v30, %v382_v29 }
 0x1b9   : > { %394 = vst.msk [vmem:[#allocation3] sm:$0x1] %vm393_vm5, %v392_v31 }
 0x1ba   : > { %v695_v34 = vmov 0.0  }
 0x1c0   : > { %v399_v32 = vld [vmem:[#allocation3] sm:$0x1] }
 0x1c1   : > { %v400_v33 = vmul.f32 0.03125, %v399_v32 }
 0x1c2 LB: >> { %s585_s16 = sshll.u32 %s701_s15, 4  ;;  %s406_s15 = sadd.s32 1, %s701_s15   ;;  %s701_s15 = sphi %s699_s15, %s406_s15   ;;  %v697_v34 = vphi %v695_v34, %v696_v34  }
 0x1c3   : >> { %v413_v35 = vperm.slane %v400_v33, 0  ;;  %s409_s17 = scalar_lea.vmem [#allocation4], %s585_s16  ;;  %p403_p6 = scmp.ge.s32.totalorder %s406_s15, 2  }
 0x1c4   : >> { %v410_v36 = vld [vmem:[%s409_s17] sm:$0xff]  ;;  %v411_v37 = vld [vmem:[%s409_s17 + $0x8] sm:$0xff]  ;;  %s703_s24 = smov (%p403_p6), 0  }
 0x1c5   : >> { %v415_v38 = vsub.f32 %v410_v36, %v413_v35  ;;  %v416_v39 = vsub.f32 %v411_v37, %v413_v35  ;;  %v430_v59 = vld [vmem:[%s804_s4] sm:$0x1] (%p403_p6) }
 0x1c6   : > { %v443_v63 = vld [vmem:[%s805_s5] sm:$0x1] (%p403_p6) }
 0x1c7   : >> { %v417_v40 = vmul.f32 %v415_v38, %v415_v38  ;;  %v418_v41 = vmul.f32 %v416_v39, %v416_v39 }
 0x1c9   : >> { %v419_v42 = vsel %vm379_vm4, %v417_v40, 0.0  ;;  %v420_v43 = vsel %vm379_vm4, %v418_v41, 0.0 }
 0x1ca   : >> { %v421_v44 = vadd.f32 %v420_v43, %v419_v42 }
 0x1cc   : >> { %v422_v45 = vrot.slane %v421_v44, 4 }
 0x1ce   : >> { %v423_v46 = vadd.f32 %v422_v45, %v421_v44 }
 0x1d0   : >> { %v424_v47 = vrot.slane %v423_v46, 2 }
 0x1d2   : >> { %v425_v48 = vadd.f32 %v424_v47, %v423_v46 }
 0x1d4   : >> { %v426_v49 = vrot.slane %v425_v48, 1 }
 0x1d6   : >> { %v427_v50 = vadd.f32 %v426_v49, %v425_v48  ;;  %405 = sbr.rel (!%p403_p6) target bundleno = 450 (0x1c2), region = 100 }
 0x1d8   : >> { %v428_v51 = vadd.f32 %v697_v34, %v427_v50  }
 0x1da   : >> { %v696_v34 = vmov %v428_v51   ;;  %v429_v52 = vmul.f32 (%p403_p6), 0.03125, %v428_v51 }
 0x1dc   : > { %v431_v53 = vadd.f32 1e-05, %v429_v52 }
 0x1de   : > { %641 = vrsqrt.f32 %v431_v53  ;;  %vm438_vm6 = vweird.f32 %v431_v53 }
 0x1e4   : > { %v642_v54 = vpop.eup %641 }
 0x1e5   : > { %v433_v55 = vmul.f32 %v642_v54, %v431_v53  ;;  %vm439_vm7 = vweird.f32 %v642_v54 }
 0x1e6   : > { %vm440_vm8 = vmor %vm438_vm6, %vm439_vm7 }
 0x1e7   : > { %v434_v56 = vmul.f32 %v642_v54, %v433_v55 }
 0x1e9   : > { %v435_v57 = vmul.f32 0.5, %v434_v56 }
 0x1eb   : > { %v436_v58 = vsub.f32 1.5, %v435_v57 }
 0x1ed   : > { %v437_v60 = vmul.f32 %v642_v54, %v436_v58 }
 0x1ef   : > { %v441_v61 = vsel %vm440_vm8, %v642_v54, %v437_v60 }
 0x1f0   : > { %v442_v62 = vmul.f32 %v441_v61, %v430_v59 }
 0x1f2   : > { %v444_v0 = vmul.f32 %v442_v62, %v400_v33 }
 0x1f4   : > { %v445_v1 = vsub.f32 %v443_v63, %v444_v0 }
 0x1f5 LB: >> { %v457_v2 = vperm.slane %v442_v62, 0  ;;  %s586_s25 = sshll.u32 %s705_s24, 4  ;;  %s451_s24 = sadd.s32 1, %s705_s24   ;;  %s705_s24 = sphi %s703_s24, %s451_s24  }
 0x1f6   : >> { %v462_v3 = vperm.slane %v445_v1, 0  ;;  %s453_s26 = scalar_lea.vmem [#allocation4], %s586_s25  ;;  %p448_p7 = scmp.ge.s32.totalorder %s451_s24, 2  }
 0x1f7   : >> { %v454_v4 = vld [vmem:[%s453_s26] sm:$0xff]  ;;  %v455_v5 = vld [vmem:[%s453_s26 + $0x8] sm:$0xff] }
 0x1f8   : >> { %v459_v6 = vmul.f32 %v457_v2, %v454_v4  ;;  %v460_v7 = vmul.f32 %v457_v2, %v455_v5 }
 0x1f9   : > { %450 = sbr.rel (!%p448_p7) target bundleno = 501 (0x1f5), region = 111 }
 0x1fa   : >> { %v464_v8 = vadd.f32 %v462_v3, %v459_v6  ;;  %v465_v9 = vadd.f32 %v462_v3, %v460_v7 }
 0x1fc   : >> { %466 = vst.msk [vmem:[%s453_s26] sm:$0xff] %vm379_vm4, %v464_v8 }
 0x1fd   : >> { %467 = vst.msk [vmem:[%s453_s26 + $0x8] sm:$0xff] %vm379_vm4, %v465_v9 }
 0x1fe PF: > { %p602_p8 = scmp.eq.s32.totalorder %s752_s22, 1  ;;  %s709_s27 = smov [#allocation4]  }
 0x1ff   : > { %s473_s28 = sshll.u32 %s709_s27, 4  ;;  %s475_s7 = sshll.u32 %s806_s6, 4  ;;  %s474_s28 = int_to_ptr.vmem [resolvable:$true] %s473_s28  ;;  %s476_s7 = int_to_ptr.hbm [resolvable:$true] %s475_s7 }
 0x200   : > { %s710_s9 = smov 128  }
 0x201   : > { %599 = dma.vmem_to_hbm [thread:$0]  (%p602_p8), %s474_s28, 512, %s476_s7, [#allocation5], %s710_s9, %s710_s9, %s708_s8  }
 0x202   : > { %688 = dma.done.wait (%p602_p8), [#allocation5], 512  }
 0x203   : > { %690 = vsyncadd (%p602_p8), [#allocation5], 4294966784 }
 0x204 PF: > { %s17_s21 = sadd.s32 1, %s693_s21  }
 0x205   : > { %p14_p9 = scmp.ge.s32.totalorder %s17_s21, 4  }
 0x207   :  { %16 = sbr.rel (!%p14_p9) target bundleno = 1 (0x1), region = 122 }
 0x20c   :  { %492 = vsyncpa [#allocation5], 1 }
 0x20d   :  { %494 = vsyncpa [#allocation5 + $0x1], 1 }

</bundles_post_ra>
